<compile_context>
chip_gen: v6e
topology: v6e:2x2x1
jax: 0.10.0
libtpu: 0.0.40
codegen_flags: <defaults>
</compile_context>

<pallas_src>
import functools

import jax
import jax.numpy as jnp
from jax.experimental import pallas as pl
from jax.experimental.pallas import tpu as pltpu


# ------------------------------- Pallas kernel --------------------------------

def _inv1x1_kernel(w_ref, z_ref, o_ref):
    """One (C, TILE_T) time-tile of out = W @ z (batch squeezed by the grid).

    w_ref: (C, C)        -- channel-mixing weight (VMEM-resident, same every block)
    z_ref: (C, TILE_T)   -- lane-dense activation tile
    o_ref: (C, TILE_T)
    """
    o_ref[...] = jnp.dot(w_ref[...], z_ref[...],
                         preferred_element_type=jnp.float32).astype(o_ref.dtype)


# --------------------------------- wrappers -----------------------------------

def _mix_channels(z, w, *, tile_cap=32768):
    """out[b] = w @ z[b] for z:(B, C, T), via a (B, T-tile) parallel Pallas grid.

    tile_cap caps the lane width of one block.  If T <= tile_cap the whole time
    axis is one full-extent block (legal even when T % 128 != 0); otherwise the
    tile is a multiple of 128 and the ragged last block is masked by Pallas.
    """
    B, C, T = z.shape
    out_dtype = z.dtype
    itemsize = jnp.dtype(out_dtype).itemsize

    if T <= tile_cap:
        tile = T                                   # full-extent block, no masking
    else:
        tile = max(128, (tile_cap // 128) * 128)   # lane-dense multiple of 128
    n_t = pl.cdiv(T, tile)

    cost = pl.CostEstimate(
        flops=2 * B * C * C * T,
        transcendentals=0,
        bytes_accessed=2 * B * C * T * itemsize + C * C * jnp.dtype(w.dtype).itemsize,
    )

    return pl.pallas_call(
        _inv1x1_kernel,
        out_shape=jax.ShapeDtypeStruct((B, C, T), out_dtype),
        grid=(B, n_t),
        in_specs=[
            pl.BlockSpec((C, C), lambda b, t: (0, 0)),          # resident weight
            pl.BlockSpec((None, C, tile), lambda b, t: (b, 0, t)),
        ],
        out_specs=pl.BlockSpec((None, C, tile), lambda b, t: (b, 0, t)),
        compiler_params=pltpu.CompilerParams(
            dimension_semantics=("parallel", "parallel")),
        cost_estimate=cost,
    )(w, z)


def invertible_1x1_conv_forward(z, W, *, tile_cap=32768):
    """Mirrors Invertible1x1Conv.forward(z, reverse=False): returns (W @ z, log_det_W)."""
    B, C, T = z.shape
    z_out = _mix_channels(z, W, tile_cap=tile_cap)
    # TODO(synk): the tiny c x c log-determinant stays in plain JAX glue (runs per
    # call since W is a traced argument; cost is negligible vs. the matmul).
    sign, logabs = jnp.linalg.slogdet(W)
    log_det_W = B * T * jnp.where(sign > 0, logabs, jnp.nan)  # det(W) > 0 by construction
    return z_out, log_det_W


def invertible_1x1_conv_reverse(z, W, *, tile_cap=32768):
    """Mirrors Invertible1x1Conv.forward(z, reverse=True): applies W^{-1} with the same kernel."""
    # TODO(synk): tiny c x c inverse stays in plain JAX glue (recomputed per call).
    W_inv = jnp.linalg.inv(W)
    return _mix_channels(z, W_inv, tile_cap=tile_cap)


# ----------------------------------- main --------------------------------------

if __name__ == "__main__":
    key = jax.random.PRNGKey(0)
    kw, kz = jax.random.split(key)

    # (batch, group_size, n_of_groups) — WaveGlow uses group_size = 8.
    # T deliberately not a multiple of 128 to exercise the no-pad path.
    B, C, T = 2, 8, 2000

    # Weight init exactly as the module: QR-orthogonal with det(W) > 0.
    A = jax.random.normal(kw, (C, C), jnp.float32)
    Q, _ = jnp.linalg.qr(A)
    W = jnp.where(jnp.linalg.det(Q) < 0, Q.at[:, 0].set(-Q[:, 0]), Q)

    z = jax.random.normal(kz, (B, C, T), jnp.float32)

    fwd = jax.jit(functools.partial(invertible_1x1_conv_forward, tile_cap=32768))
    z_out, log_det_W = fwd(z, W)
    z_out = jax.block_until_ready(z_out)
    log_det_W = jax.block_until_ready(log_det_W)

    # Pure-JAX reference.
    ref_out = jnp.einsum('oc,bct->bot', W, z)
    ref_logdet = B * T * jnp.linalg.slogdet(W)[1]
    assert z_out.shape == (B, C, T)
    assert z_out.dtype == z.dtype
    assert jnp.allclose(z_out, ref_out, atol=1e-5, rtol=1e-5), \
        float(jnp.max(jnp.abs(z_out - ref_out)))
    assert jnp.allclose(log_det_W, ref_logdet, atol=1e-4, rtol=1e-4)

    # Also exercise the tiled (multi-block, masked-tail) path with a small cap.
    fwd_tiled = jax.jit(functools.partial(invertible_1x1_conv_forward, tile_cap=512))
    z_out_t, _ = fwd_tiled(z, W)
    z_out_t = jax.block_until_ready(z_out_t)
    assert jnp.allclose(z_out_t, ref_out, atol=1e-5, rtol=1e-5)

    # Reverse path (same kernel with W^{-1}) round-trips back to z.
    rev = jax.jit(functools.partial(invertible_1x1_conv_reverse, tile_cap=32768))
    z_rec = jax.block_until_ready(rev(z_out, W))
    assert jnp.allclose(z_rec, z, atol=1e-4, rtol=1e-4)

    print("KERNEL_OK")
</pallas_src>

<mosaic_0001>
module attributes {stable_mosaic.version = 11 : i64} {
  func.func @_inv1x1_kernel(%arg0: i32, %arg1: i32, %arg2: memref<8x8xf32, #tpu.memory_space<vmem>>, %arg3: memref<1x8x2000xf32, #tpu.memory_space<vmem>>, %arg4: memref<1x8x2000xf32, #tpu.memory_space<vmem>>) attributes {dimension_semantics = [#tpu.dimension_semantics<parallel>, #tpu.dimension_semantics<parallel>], iteration_bounds = array<i64: 2, 1>, scalar_prefetch = 0 : i64, scratch_operands = 0 : i64, tpu.core_type = #tpu.core_type<tc>, window_params = [{pipeline_mode = #tpu.pipeline_mode<synchronous>, transform_indices = @transform_0, window_bounds = array<i64: 8, 8>}, {transform_indices = @transform_1, window_bounds = array<i64: 1, 8, 2000>}, {transform_indices = @transform_2, window_bounds = array<i64: 1, 8, 2000>}]} {
    %c0 = arith.constant 0 : index
    %c0_0 = arith.constant 0 : index
    %0 = vector.load %arg2[%c0, %c0_0] : memref<8x8xf32, #tpu.memory_space<vmem>>, vector<8x8xf32>
    %c0_1 = arith.constant 0 : index
    %c0_2 = arith.constant 0 : index
    %c0_3 = arith.constant 0 : index
    %1 = vector.load %arg3[%c0_1, %c0_2, %c0_3] : memref<1x8x2000xf32, #tpu.memory_space<vmem>>, vector<1x8x2000xf32>
    %2 = vector.shape_cast %1 : vector<1x8x2000xf32> to vector<8x2000xf32>
    %cst = arith.constant dense<0.000000e+00> : vector<8x2000xf32>
    %3 = tpu.matmul %0, %2, %cst {dimension_numbers = #tpu.dot_dimension_numbers<[1], [0], [0], [1], [0, 0, 1, 1], [], []>} : vector<8x8xf32>, vector<8x2000xf32>, vector<8x2000xf32> -> vector<8x2000xf32>
    %c0_4 = arith.constant 0 : index
    %c0_5 = arith.constant 0 : index
    %c0_6 = arith.constant 0 : index
    %4 = vector.load %arg4[%c0_4, %c0_5, %c0_6] : memref<1x8x2000xf32, #tpu.memory_space<vmem>>, vector<1x8x2000xf32>
    %5 = vector.shape_cast %4 : vector<1x8x2000xf32> to vector<8x2000xf32>
    %6 = vector.shape_cast %3 : vector<8x2000xf32> to vector<1x8x2000xf32>
    tpu.vector_store %arg4[%c0_4, %c0_5, %c0_6], %6 {strides = array<i32>} : memref<1x8x2000xf32, #tpu.memory_space<vmem>>, vector<1x8x2000xf32>,
    return
  }
  func.func @transform_0(%arg0: i32, %arg1: i32) -> (i32, i32) {
    %c0_i32 = arith.constant 0 : i32
    %c0_i32_0 = arith.constant 0 : i32
    %c0_i32_1 = arith.constant 0 : i32
    return %c0_i32, %c0_i32_0 : i32, i32
  }
  func.func @transform_1(%arg0: i32, %arg1: i32) -> (i32, i32, i32) {
    %c0_i32 = arith.constant 0 : i32
    %c0_i32_0 = arith.constant 0 : i32
    return %arg0, %c0_i32, %arg1 : i32, i32, i32
  }
  func.func @transform_2(%arg0: i32, %arg1: i32) -> (i32, i32, i32) {
    %c0_i32 = arith.constant 0 : i32
    %c0_i32_0 = arith.constant 0 : i32
    return %arg0, %c0_i32, %arg1 : i32, i32, i32
  }
}

</mosaic_0001>

<bundles_post_ra>
// kernel: custom-call.2
= control target key start
LH: loop header
LB: loop body
LE: loop exit
PB: predicated region body
PF: predicated region fallthrough
CT: control target
= control target key end

     0   :  { %5 = vsyncpa [#allocation1], 0  ;;  %s630_s0 = inlined_call_operand.hbm [shape: f32[8,8], index: 0, kind: input, shape index: {}]   ;;  %s631_s1 = inlined_call_operand.vmem [shape: f32[8,8], index: 1, kind: output, shape index: {0}]   ;;  %s632_s2 = inlined_call_operand.vmem [shape: s32[8], index: 2, kind: output, shape index: {1}]   ;;  %s633_s3 = inlined_call_operand.hbm [shape: s32[8], index: 3, kind: output, shape index: {2}]  }
   0x1   :  { %6 = vsyncpa [#allocation2], 0  ;;  %s560_s12 = smov [#allocation0]  }
   0x2   :  { %s10_s13 = sshll.u32 %s560_s12, 4  ;;  %s11_s13 = int_to_ptr.vmem [resolvable:$true] %s10_s13 }
   0x3   :  { %s480_s14 = scalar_lea.vmem %s11_s13, 128  ;;  %p485_p1 = scmp.lt.s32.totalorder %s11_s13, %s11_s13 }
   0x4   :  { %p481_p0 = scmp.ne.s32.totalorder %s11_s13, %s480_s14  ;;  %p486_p2 = scmp.lt.s32.totalorder %s480_s14, %s480_s14 }
   0x6   :  { %p487_p3 = por %p486_p2, %p485_p1 }
   0x8   :  { %p488_p4 = pnand %p487_p3, %p481_p0 }
   0xa   :  { %491 = shalt.err (!%p488_p4)
}
   0xb   :  { %13 = dma.hbm_to_vmem [thread:$0]  %s630_s0, 128, %s11_s13, [#allocation1]  }
   0xc   :  { %544 = dma.done.wait [#allocation1], 128  }
   0xd   :  { %545 = vsyncadd [#allocation1], 4294967168  ;;  %v18_v0 = vlaneseq  ;;  %v561_v1 = vmov 0   ;;  %v15_v3 = vld [vmem:[#allocation0] sm:$0xff]  ;;  %s590_s17 = smov 0  }
   0xe   :  { %17 = vst [vmem:[#allocation4] sm:$0x1] %v561_v1  ;;  %16 = vst [vmem:[#allocation3] sm:$0xff] %v15_v3 }
   0xf   :  { %v587_v2 = vshrl.u32 %v18_v0, 7 }
  0x11   :  { %22 = vst [vmem:[#allocation8] sm:$0xff] %v587_v2 }
  0x12 LB: > { %v596_v6 = vstv %s550_s17  ;;  %s79_s0 = ssub.s32 128, %s550_s17  ;;  %v85_v36 = vand.u32 127, %v18_v0  ;;  %s91_s18 = scalar_lea.vmem [#allocation3], %s550_s17  ;;  %s550_s17 = sphi %s590_s17, %s28_s17  }
  0x13   : > { %vm37_vm0 = vcmp.ge.s32.totalorder %v587_v2, %v596_v6  ;;  %s97_s20 = scalar_lea.vmem [#allocation8], %s550_s17  ;;  %vm117_vm13 = vcmp.gt.s32.totalorder %v587_v2, %v596_v6  ;;  %s28_s17 = sadd.s32 1, %s550_s17  }
  0x14   : > { %vm109_vm10 = vcmp.gt.s32.totalorder %v85_v36, %v596_v6  ;;  %vm86_vm11 = vcmp.eq.s32.totalorder %v85_v36, %v596_v6  ;;  %p25_p5 = scmp.ge.s32.totalorder %s28_s17, 8  }
  0x15   : > { %v33_v4 = vld [vmem:[#allocation3] sm:$0xff]  ;;  %v88_v38 = vld [vmem:[#allocation4] ss:$0 sm:$0xff]  ;;  %v93_v39 = vld [vmem:[%s91_s18] ss:$0 sm:$0xff]  ;;  %s552_s25 = smov (%p25_p5), %s631_s1   ;;  %s556_s26 = smov (%p25_p5), [#allocation3]  }
  0x16   : > { %v34_v5 = vand.u32 2147483647, %v33_v4  ;;  %vm121_vm15 = vmand %vm117_vm13, %vm86_vm11 }
  0x18   : > { %vm392_vm1 = vcmp.gt.f32.partialorder %v34_v5, -inf  ;;  %v99_v40 = vld [vmem:[%s97_s20] ss:$0 sm:$0xff] }
  0x19   : > { %vm41_vm2 = vmand %vm37_vm0, %vm392_vm1 }
  0x1a   : > { %v42_v7 = vsel %vm41_vm2, %v587_v2, %v596_v6  ;;  %v43_v8 = vsel %vm41_vm2, %v34_v5, -inf }
  0x1b   : > { %v44_v9 = vrot.slane %v43_v8, 1  ;;  %v45_v10 = vrot.slane %v42_v7, 1 }
  0x1d   : > { %vm46_vm3 = vcmp.ge.f32.partialorder %v44_v9, %v43_v8  ;;  %v49_v11 = vrot.slane %v44_v9, 1  ;;  %v50_v12 = vrot.slane %v45_v10, 1 }
  0x1e   : > { %v47_v13 = vsel %vm46_vm3, %v44_v9, %v43_v8  ;;  %v48_v14 = vsel %vm46_vm3, %v45_v10, %v42_v7 }
  0x1f   : > { %vm51_vm4 = vcmp.ge.f32.partialorder %v49_v11, %v47_v13  ;;  %v54_v15 = vrot.slane %v49_v11, 1  ;;  %v55_v16 = vrot.slane %v50_v12, 1 }
  0x20   : > { %v52_v17 = vsel %vm51_vm4, %v49_v11, %v47_v13  ;;  %v53_v18 = vsel %vm51_vm4, %v50_v12, %v48_v14 }
  0x21   : > { %vm56_vm5 = vcmp.ge.f32.partialorder %v54_v15, %v52_v17  ;;  %v59_v19 = vrot.slane %v54_v15, 1  ;;  %v60_v20 = vrot.slane %v55_v16, 1 }
  0x22   : > { %v57_v21 = vsel %vm56_vm5, %v54_v15, %v52_v17  ;;  %v58_v22 = vsel %vm56_vm5, %v55_v16, %v53_v18 }
  0x23   : > { %vm61_vm6 = vcmp.ge.f32.partialorder %v59_v19, %v57_v21  ;;  %v64_v23 = vrot.slane %v59_v19, 1  ;;  %v65_v24 = vrot.slane %v60_v20, 1 }
  0x24   : > { %v62_v25 = vsel %vm61_vm6, %v59_v19, %v57_v21  ;;  %v63_v26 = vsel %vm61_vm6, %v60_v20, %v58_v22 }
  0x25   : > { %vm66_vm7 = vcmp.ge.f32.partialorder %v64_v23, %v62_v25  ;;  %v69_v27 = vrot.slane %v64_v23, 1  ;;  %v70_v28 = vrot.slane %v65_v24, 1 }
  0x26   : > { %v67_v29 = vsel %vm66_vm7, %v64_v23, %v62_v25  ;;  %v68_v30 = vsel %vm66_vm7, %v65_v24, %v63_v26 }
  0x27   : > { %vm71_vm8 = vcmp.ge.f32.partialorder %v69_v27, %v67_v29  ;;  %v74_v31 = vrot.slane %v69_v27, 1  ;;  %v75_v32 = vrot.slane %v70_v28, 1 }
  0x28   : > { %v72_v33 = vsel %vm71_vm8, %v69_v27, %v67_v29  ;;  %v73_v34 = vsel %vm71_vm8, %v70_v28, %v68_v30 }
  0x29   : > { %vm76_vm9 = vcmp.ge.f32.partialorder %v74_v31, %v72_v33 }
  0x2a   : > { %v78_v35 = vsel %vm76_vm9, %v75_v32, %v73_v34 }
  0x2b   : > { %80 = vrot.lane.b32.xlu0 %v78_v35, %s79_s0 }
  0x9d   : > { %v81_v37 = vpop.permute.xlu0 %80 }
  0x9e   : > { %400 = vpush %v81_v37 }
  0xcf   : > { %s401_s19 = spop %400 }
  0xd0   : > { %v87_v41 = vstv %s401_s19  ;;  %s92_s21 = scalar_lea.vmem [#allocation3], %s401_s19  ;;  %s98_s22 = scalar_lea.vmem [#allocation8], %s401_s19 }
  0xd1   : > { %v94_v42 = vld [vmem:[%s92_s21] ss:$0 sm:$0xff]  ;;  %v89_v44 = vsel %vm86_vm11, %v87_v41, %v88_v38 }
  0xd2   : > { %v100_v43 = vld [vmem:[%s98_s22] ss:$0 sm:$0xff]  ;;  %95 = vst [vmem:[%s92_s21] sm:$0x1] %v93_v39  ;;  %vm103_vm12 = vcmp.ne.f32.partialorder %v94_v42, 0.0  ;;  %90 = vst [vmem:[#allocation4] sm:$0x1] %v89_v44 }
  0xd3   : > { %101 = vst [vmem:[%s98_s22] sm:$0x1] %v99_v40  ;;  %96 = vst [vmem:[%s91_s18] sm:$0x1] %v94_v42  ;;  %v110_v51 = vsel %vm109_vm10, %v94_v42, 0.0 }
  0xd4   : > { %102 = vst [vmem:[%s97_s20] sm:$0x1] %v100_v43  ;;  %vm104_vm14 = vmand %vm86_vm11, %vm103_vm12 }
  0xd5   : > { %v105_v45 = vsel %vm104_vm14, %v94_v42, 1.0 }
  0xd6   : > { %v118_v46 = vsel %vm117_vm13, %v105_v45, 1.0 }
  0xd7   : > { %470 = vrcp.f32 %v118_v46 }
  0xd9   :  { %v181_v56 = vld [vmem:[#allocation4] sm:$0x1] (%p25_p5) }
  0xda   : > { %v114_v48 = vld [vmem:[#allocation3] sm:$0xff]  ;;  %184 = vst [vmem:[#allocation5] sm:$0x1] (%p25_p5), %v181_v56 }
  0xdb   :  { %v128_v55 = vld [vmem:[#allocation8] sm:$0xff] (%p25_p5) }
  0xe4   : > { %v471_v47 = vpop.eup %470 }
  0xe5   : > { %v120_v49 = vmul.f32 %v471_v47, %v114_v48 }
  0xe7   : > { %v122_v50 = vsel %vm121_vm15, %v120_v49, 0.0 }
  0xe8   : > { %123 = vadd.xlane.f32.xlu0 %v122_v50 }
 0x115   :  { %144 = vxpose.xlu0.b32.start.end [1/1] (short) (narrow) (%p25_p5), %v128_v55, 8 }
 0x171   : > { %v124_v52 = vpop.xlane.xlu0 %123 }
 0x172   : > { %v125_v53 = vmul.f32 %v124_v52, %v110_v51  ;;  %27 = sbr.rel (!%p25_p5) target bundleno = 18 (0x12), region = 112 }
 0x174   : > { %v126_v54 = vsub.f32 %v120_v49, %v125_v53 }
 0x176   : > { %127 = vst [vmem:[#allocation3] sm:$0xff] %v126_v54 }
 0x191   :  { %v160_v57 = vpop.trf.xlu0 }
 0x192   :  { %176 = vst [vmem:[#allocation6] sm:$0x1] %v160_v57 }
 0x199   :  { %v189_v58 = vld [vmem:[#allocation6] sm:$0x1] }
 0x19a   :  { %192 = vst [vmem:[#allocation7] sm:$0x1] %v189_v58 }
 0x19b LB: > { %v240_v59 = vld [vmem:[%s558_s26] sm:$0xff]  ;;  %s242_s26 = scalar_lea.vmem %s558_s26, 8   ;;  %s558_s26 = sphi %s556_s26, %s242_s26   ;;  %s554_s25 = sphi %s552_s25, %s243_s25  }
 0x19c   : > { %241 = vst [vmem:[%s554_s25] sm:$0xff] %v240_v59  ;;  %s243_s25 = scalar_lea.vmem %s554_s25, 8   ;;  %p237_p6 = scmp.gt.s32.totalorder %s242_s26, [#allocation3] }
 0x19d   :  { %v319_v60 = vld [vmem:[#allocation5] sm:$0x1] (%p237_p6)  ;;  %s562_s29 = smov (%p237_p6), [#allocation7]  }
 0x19e   :  { %239 = sbr.rel (!%p237_p6) target bundleno = 411 (0x19b), region = 134  ;;  %320 = vst [vmem:[%s632_s2] sm:$0x1] (%p237_p6), %v319_v60  ;;  %s326_s1 = sshll.u32 (%p237_p6), %s562_s29, 4  ;;  %s327_s1 = int_to_ptr.vmem [resolvable:$true] %s326_s1 }
 0x19f   :  { %s492_s30 = scalar_lea.vmem (%p237_p6), %s327_s1, 16  ;;  %s496_s4 = scalar_lea.vmem (%p237_p6), %s327_s1, 32 }
 0x1a0   :  { %p493_p7 = scmp.ne.s32.totalorder (%p237_p6), %s327_s1, %s492_s30  ;;  %p497_p8 = scmp.lt.s32.totalorder (%p237_p6), %s327_s1, %s327_s1 }
 0x1a1   :  { %p498_p9 = scmp.lt.s32.totalorder (%p237_p6), %s496_s4, %s492_s30 }
 0x1a3   :  { %p499_p10 = por %p498_p9, %p497_p8 }
 0x1a5   :  { %p500_p11 = pnand %p499_p10, %p493_p7 }
 0x1a7   :  { %503 = shalt.err (!%p500_p11)
}
 0x1a8   :  { %329 = dma.vmem_to_hbm [thread:$0]  %s327_s1, 16, %s633_s3, [#allocation2]  }
 0x1a9   :  { %546 = dma.done.wait [#allocation2], 16  }
 0x1aa   :  { %547 = vsyncadd [#allocation2], 4294967280 }
 0x1ab   :  { %335 = vsyncpa [#allocation1], 1 }
 0x1ac   :  { %336 = vsyncpa [#allocation2], 1 }

// kernel: invertible_1x1_conv_forward.1
= control target key start
LH: loop header
LB: loop body
LE: loop exit
PB: predicated region body
PF: predicated region fallthrough
CT: control target
= control target key end

     0   :  { %7 = vsyncpa [#allocation3], 0  ;;  %s1209_s0 = inlined_call_operand.vmem [shape: f32[8,8], index: 0, kind: input, shape index: {}]   ;;  %s1210_s1 = inlined_call_operand.vmem [shape: f32[2,8,2000], index: 1, kind: input, shape index: {}]   ;;  %s1211_s2 = inlined_call_operand.hbm [shape: f32[2,8,2000], index: 2, kind: output, shape index: {}]  }
   0x1   :  { %9 = vsyncpa [#allocation3 + $0x1], 0  ;;  %s1046_s9 = smov 0   ;;  %s1048_s10 = smov 0  }
   0x2   :  { %s1050_s11 = smov 0   ;;  %s1052_s12 = smov 0  }
   0x3   :  { %s1054_s13 = smov 0   ;;  %s1056_s14 = smov 0  }
   0x4 LB: > { %s872_s15 = sadd.s32 4294967295, %s1027_s14   ;;  %s873_s16 = sadd.s32 4294967294, %s1027_s14   ;;  %s1027_s14 = sphi %s1056_s14, %s15_s14   ;;  %s1023_s13 = sphi %s1054_s13, %s1218_s13   ;;  %s1019_s12 = sphi %s1052_s12, %s1217_s12   ;;  %s1015_s11 = sphi %s1050_s11, %s1216_s11   ;;  %s1011_s10 = sphi %s1048_s10, %s1215_s10   ;;  %s1007_s9 = sphi %s1046_s9, %s1214_s9  }
   0x5   : > { %s27_s17 = sadd.s32 1, %s1023_s13  ;;  %s85_s18 = sadd.s32 1, %s1015_s11 }
   0x6   : > { %p29_p0 = scmp.ge.s32.totalorder %s27_s17, 2  ;;  %p95_p1 = scmp.ne.s32.totalorder %s1015_s11, %s1011_s10 }
   0x7   : > { %p96_p2 = scmp.eq.s32.totalorder %s872_s15, 1  ;;  %p101_p3 = scmp.ne.s32.totalorder %s1011_s10, %s1007_s9 }
   0x8   : > { %s1220_s17 = smov (%p29_p0, %s27_s17), 0  ;;  %p102_p5 = scmp.eq.s32.totalorder %s873_s16, 1 }
   0x9   : > { %p1086_p4 = por %p96_p2, %p95_p1  ;;  %s80_s20 = ssub.s32 %s1023_s13, %s1220_s17 }
   0xa   : > { %p876_p6 = scmp.ge.s32.totalorder %s1027_s14, 1  ;;  %p83_p7 = scmp.eq.s32.totalorder %s80_s20, 0 }
   0xb   : > { %p1093_p8 = por %p102_p5, %p101_p3  ;;  %p136_p9 = scmp.lt.s32.totalorder %s1027_s14, 3 }
   0xc   : > { %s1099_s22 = scalar_select %p83_p7, %s1015_s11, %s85_s18  }
   0xd   : > { %p137_p10 = pnand %p876_p6, %p136_p9 }
   0xe   : > { %p163_p11 = scmp.lt.s32.totalorder (!%p137_p10), %s1019_s12, 1  ;;  %s159_s30 = sand.u32 (!%p137_p10), 1, %s1011_s10  }
   0xf   : > { %140 = sbr.rel (%p137_p10) target bundleno = 247 (0xf7), region = 28  ;;  %s877_s3 = sshll.u32 (!%p137_p10), %s159_s30, 7 }
  0x10   : > { %s1138_s4 = scalar_lea.vmem (!%p137_p10), [#allocation2], %s877_s3  ;;  %s894_s5 = sshll.u32 (!%p137_p10), %s1019_s12, 11 }
  0x11   : > { %s796_s6 = sshll.u32 (!%p137_p10), %s1138_s4, 4  ;;  %s1159_s15 = scalar_lea.hbm (!%p137_p10), %s1211_s2, %s894_s5  ;;  %s1161_s6 = int_to_ptr.vmem [resolvable:$true] %s796_s6 }
  0x12   : > { %s951_s16 = scalar_lea.vmem (!%p137_p10), %s1161_s6, 2048  ;;  %s1030_s18 = smov (!%p137_p10), [#allocation2]  }
  0x13   : > { %p952_p12 = scmp.ne.s32.totalorder (!%p137_p10), %s1161_s6, %s951_s16  ;;  %s955_s20 = sshll.u32 (!%p137_p10), %s1030_s18, 4  ;;  %s956_s20 = int_to_ptr.vmem [resolvable:$false] %s955_s20 }
  0x14   : > { %v1029_v0 = vmov 0.0   ;;  %s164_s23 = scalar_select %p163_p11, %s1019_s12, 1  ;;  %v173_v1 = vld [vmem:[%s1209_s0] sm:$0xff]  ;;  %vm190_vm0 = vcmask 64512   ;;  %vm777_vm1 = vcmask 654336  }
  0x15   : > { %258 = vmatprep.mubr.f32.mxu0 %v1029_v0  ;;  %329 = vmatprep.mubr.f32.mxu1 %v1029_v0  ;;  %s780_s12 = scalar_lea.sflag [#allocation3], %s159_s30  ;;  %p953_p13 = pnand %p952_p12, %p1086_p4 }
  0x16   : > { %s893_s24 = sshll.u32 %s164_s23, 7  ;;  %s957_s23 = scalar_lea.vmem %s956_s20, 4096 }
  0x17   : > { %s1106_s27 = scalar_lea.vmem %s1210_s1, %s893_s24  ;;  %p954_p0 = pneg %p953_p13 }
  0x18   : > { %v175_v2 = vld [vmem:[%s1106_s27 + $0x8] sm:$0xff]  ;;  %v177_v3 = vld [vmem:[%s1106_s27 + $0x18] sm:$0xff]  ;;  %v174_v4 = vld [vmem:[%s1106_s27] sm:$0xff]  ;;  %p958_p1 = scmp.lt.s32.totalorder %s1161_s6, %s956_s20  ;;  %p959_p2 = scmp.lt.s32.totalorder %s957_s23, %s951_s16 }
  0x19   : > { %224 = vmatprep.subr.mxu0 %v175_v2  ;;  %295 = vmatprep.subr.mxu1 %v177_v3  ;;  %v176_v5 = vld [vmem:[%s1106_s27 + $0x10] sm:$0xff]  ;;  %v179_v6 = vld [vmem:[%s1106_s27 + $0x28] sm:$0xff]  ;;  %v181_v7 = vld [vmem:[%s1106_s27 + $0x38] sm:$0xff] }
  0x1a   : > { %225 = vmatpush1.msra.mxu0 %v174_v4  ;;  %296 = vmatpush1.msra.mxu1 %v176_v5  ;;  %v178_v8 = vld [vmem:[%s1106_s27 + $0x20] sm:$0xff]  ;;  %v180_v9 = vld [vmem:[%s1106_s27 + $0x30] sm:$0xff]  ;;  %v183_v10 = vld [vmem:[%s1106_s27 + $0x48] sm:$0xff]  ;;  %p960_p3 = por %p959_p2, %p958_p1 }
  0x1b   : > { %880 = vmatmul.mubr.msk.f32.vlgmr.msra.gmra.mxu0 %vm190_vm0, %v173_v1  ;;  %881 = vmatmul.mubr.msk.f32.vlgmr.msra.gmra.mxu1 %vm190_vm0, %v173_v1  ;;  %v185_v11 = vld [vmem:[%s1106_s27 + $0x58] sm:$0xff]  ;;  %v182_v12 = vld [vmem:[%s1106_s27 + $0x40] sm:$0xff]  ;;  %v184_v13 = vld [vmem:[%s1106_s27 + $0x50] sm:$0xff] }
  0x1c   : > { %366 = vmatprep.subr.mxu0 %v179_v6  ;;  %437 = vmatprep.subr.mxu1 %v181_v7  ;;  %v187_v14 = vld [vmem:[%s1106_s27 + $0x68] sm:$0xff]  ;;  %v189_v15 = vld [vmem:[%s1106_s27 + $0x78] sm:$0xff]  ;;  %v186_v16 = vld [vmem:[%s1106_s27 + $0x60] sm:$0xff]  ;;  %p961_p5 = pnand %p960_p3, %p954_p0 }
  0x1d   : > { %367 = vmatpush1.msra.mxu0 %v178_v8  ;;  %438 = vmatpush1.msra.mxu1 %v180_v9  ;;  %v188_v17 = vld [vmem:[%s1106_s27 + $0x70] sm:$0xff] }
  0x1e   : > { %400 = vmatprep.mubr.f32.mxu0 %v1029_v0  ;;  %471 = vmatprep.mubr.f32.mxu1 %v1029_v0 }
  0x1f   : > { %882 = vmatmul.mubr.msk.f32.vlgmr.msra.gmra.mxu0 %vm190_vm0, %v173_v1  ;;  %883 = vmatmul.mubr.msk.f32.vlgmr.msra.gmra.mxu1 %vm190_vm0, %v173_v1 }
  0x20   : > { %508 = vmatprep.subr.mxu0 %v183_v10  ;;  %579 = vmatprep.subr.mxu1 %v185_v11 }
  0x21   : > { %509 = vmatpush1.msra.mxu0 %v182_v12  ;;  %580 = vmatpush1.msra.mxu1 %v184_v13 }
  0x22   : > { %542 = vmatprep.mubr.f32.mxu0 %v1029_v0  ;;  %613 = vmatprep.mubr.f32.mxu1 %v1029_v0 }
  0x23   : > { %884 = vmatmul.mubr.msk.f32.vlgmr.msra.gmra.mxu0 %vm190_vm0, %v173_v1  ;;  %885 = vmatmul.mubr.msk.f32.vlgmr.msra.gmra.mxu1 %vm190_vm0, %v173_v1 }
  0x24   : > { %650 = vmatprep.subr.mxu0 %v187_v14  ;;  %721 = vmatprep.subr.mxu1 %v189_v15 }
  0x25   : > { %651 = vmatpush1.msra.mxu0 %v186_v16  ;;  %722 = vmatpush1.msra.mxu1 %v188_v17 }
  0x26   : > { %684 = vmatprep.mubr.f32.mxu0 %v1029_v0  ;;  %755 = vmatprep.mubr.f32.mxu1 %v1029_v0 }
  0x27   : > { %886 = vmatmul.mubr.msk.f32.vlgmr.msra.gmra.mxu0 %vm190_vm0, %v173_v1  ;;  %887 = vmatmul.mubr.msk.f32.vlgmr.msra.gmra.mxu1 %vm190_vm0, %v173_v1 }
  0xdb   : > { %v260_v18 = vpop.f32.mrf.mxu0  ;;  %v331_v19 = vpop.f32.mrf.mxu1 }
  0xdc   : > { %762 = vst [vmem:[%s1138_s4] sm:$0xff] %v260_v18  ;;  %764 = vst [vmem:[%s1138_s4 + $0x10] sm:$0xff] %v331_v19 }
  0xdd   : > { %v262_v20 = vpop.f32.mrf.mxu0  ;;  %v333_v21 = vpop.f32.mrf.mxu1 }
  0xde   : > { %763 = vst [vmem:[%s1138_s4 + $0x8] sm:$0xff] %v262_v20  ;;  %765 = vst [vmem:[%s1138_s4 + $0x18] sm:$0xff] %v333_v21 }
  0xdf   : > { %v402_v22 = vpop.f32.mrf.mxu0  ;;  %v473_v23 = vpop.f32.mrf.mxu1 }
  0xe0   : > { %766 = vst [vmem:[%s1138_s4 + $0x20] sm:$0xff] %v402_v22  ;;  %768 = vst [vmem:[%s1138_s4 + $0x30] sm:$0xff] %v473_v23 }
  0xe1   : > { %v404_v24 = vpop.f32.mrf.mxu0  ;;  %v475_v25 = vpop.f32.mrf.mxu1 }
  0xe2   : > { %767 = vst [vmem:[%s1138_s4 + $0x28] sm:$0xff] %v404_v24  ;;  %769 = vst [vmem:[%s1138_s4 + $0x38] sm:$0xff] %v475_v25 }
  0xe3   : > { %v544_v26 = vpop.f32.mrf.mxu0  ;;  %v615_v27 = vpop.f32.mrf.mxu1 }
  0xe4   : > { %770 = vst [vmem:[%s1138_s4 + $0x40] sm:$0xff] %v544_v26  ;;  %772 = vst [vmem:[%s1138_s4 + $0x50] sm:$0xff] %v615_v27 }
  0xe5   : > { %v546_v28 = vpop.f32.mrf.mxu0  ;;  %v617_v29 = vpop.f32.mrf.mxu1 }
  0xe6   : > { %771 = vst [vmem:[%s1138_s4 + $0x48] sm:$0xff] %v546_v28  ;;  %773 = vst [vmem:[%s1138_s4 + $0x58] sm:$0xff] %v617_v29 }
  0xe7   : > { %v686_v30 = vpop.f32.mrf.mxu0  ;;  %v757_v31 = vpop.f32.mrf.mxu1 }
  0xe8   : > { %774 = vst [vmem:[%s1138_s4 + $0x60] sm:$0xff] %v686_v30  ;;  %776 = vst [vmem:[%s1138_s4 + $0x70] sm:$0xff] %v757_v31 }
  0xe9   : > { %v688_v32 = vpop.f32.mrf.mxu0  ;;  %v759_v33 = vpop.f32.mrf.mxu1 }
  0xea   : > { %775 = vst [vmem:[%s1138_s4 + $0x68] sm:$0xff] %v688_v32  ;;  %778 = vst.msk [vmem:[%s1138_s4 + $0x78] sm:$0xff] %vm777_vm1, %v759_v33 }
  0xeb   : > { %964 = shalt.err (!%p961_p5)
}
  0xec   : > { %s965_s24 = scalar_lea.hbm %s1159_s15, 2048  ;;  %s969_s27 = scalar_lea.hbm %s1211_s2, 4096 }
  0xed   : > { %p966_p6 = scmp.ne.s32.totalorder %s1159_s15, %s965_s24  ;;  %p970_p10 = scmp.lt.s32.totalorder %s1159_s15, %s1211_s2 }
  0xee   : > { %p971_p11 = scmp.lt.s32.totalorder %s969_s27, %s965_s24 }
  0xef   : > { %p967_p7 = pnand %p966_p6, %p1086_p4 }
  0xf0   : > { %p972_p12 = por %p971_p11, %p970_p10 }
  0xf1   : > { %p968_p9 = pneg %p967_p7 }
  0xf3   : > { %p973_p13 = pnand %p972_p12, %p968_p9 }
  0xf5   : > { %976 = shalt.err (!%p973_p13)
}
  0xf6   : > { %895 = dma.vmem_to_hbm [thread:$0]  (%p1086_p4), %s1161_s6, 2048, %s1159_s15, %s780_s12  }
  0xf7 PF: > { %p901_p0 = scmp.ge.s32.totalorder %s1027_s14, 2  ;;  %s808_s30 = sand.u32 1, %s1007_s9  }
  0xf8   : > { %s809_s3 = scalar_lea.sflag [#allocation3], %s808_s30 }
  0xf9   : > { %p898_p1 = pnand %p901_p0, %p1093_p8 }
  0xfb   : > { %p899_p2 = pneg %p898_p1 }
  0xfd   : > { %1002 = dma.done.wait (%p899_p2), %s809_s3, 2048  }
  0xfe   : > { %1004 = vsyncadd (%p899_p2), %s809_s3, 4294965248  ;;  %s15_s14 = sadd.s32 1, %s1027_s14   ;;  %s1214_s9 = smov %s1011_s10 }
  0xff   : > { %p12_p3 = scmp.ge.s32.totalorder %s15_s14, 4   ;;  %s1215_s10 = smov %s1015_s11 }
 0x100   : > { %s1216_s11 = smov %s1099_s22  ;;  %s1217_s12 = smov %s1023_s13 }
 0x101   : > { %s1218_s13 = smov %s1220_s17  ;;  %14 = sbr.rel (!%p12_p3) target bundleno = 4 (0x4), region = 63 }
 0x106   :  { %814 = vsyncpa [#allocation3], 1 }
 0x107   :  { %816 = vsyncpa [#allocation3 + $0x1], 1 }

</bundles_post_ra>
